<compile_context>
chip_gen: v6e
topology: v6e:2x2x1
jax: 0.10.0
libtpu: 0.0.40
codegen_flags: <defaults>
</compile_context>

<pallas_src>
import functools

import jax
import jax.numpy as jnp
from jax.experimental import pallas as pl
from jax.experimental.pallas import tpu as pltpu

SUB = 8      # sublane granularity (second-minor dim)
LANE = 128   # lane granularity (minor dim)


def _round_up(n: int, m: int) -> int:
    return ((n + m - 1) // m) * m


def _cdiv(a: int, b: int) -> int:
    return (a + b - 1) // b


def _pad_to(a, target_shape):
    pads = [(0, t - s) for s, t in zip(a.shape, target_shape)]
    if all(p == (0, 0) for p in pads):
        return a
    return jnp.pad(a, pads)


def word_classifier_kernel(x_ref, w1_ref, b1_ref, w2_ref, b2_ref, out_ref, acc_ref):
    """One (batch-tile, K-tile) grid step of y = relu(x @ W1 + b1) @ W2 + b2."""
    k = pl.program_id(1)

    # P3 accumulator pattern over the K (input-feature) reduction axis.
    @pl.when(k == 0)
    def _():
        acc_ref[...] = jnp.zeros_like(acc_ref)

    # fc1 partial product on the MXU, f32 accumulation.  Operands already in the
    # compute dtype (cast once in the wrapper, not per grid step).
    acc_ref[...] += jnp.dot(x_ref[...], w1_ref[...],
                            preferred_element_type=jnp.float32)

    # Epilogue only on the last K step: bias + ReLU in f32 (VPU), fc2 (MXU),
    # bias-add in f32, single lane-dense store.
    @pl.when(k == pl.num_programs(1) - 1)
    def _():
        h = jnp.maximum(acc_ref[...] + b1_ref[...], 0.0)          # (TB, Hp) f32
        y = jnp.dot(h.astype(w2_ref.dtype), w2_ref[...],
                    preferred_element_type=jnp.float32)            # (TB, Np) f32
        out_ref[...] = (y + b2_ref[...]).astype(out_ref.dtype)


def word_classifier_forward(x, w1, b1, w2, b2, *, block_b=512, max_k_block=512,
                            feature_align=LANE, use_bf16_matmul=True,
                            out_dtype=None):
    """x: (B, input_size); w1: (input_size, hidden); b1: (hidden,);
       w2: (hidden, num_classes); b2: (num_classes,). Returns (B, num_classes).

       Weights use (in, out) layout; nn.Linear stores (out, in) and computes
       x @ W.T + b, so transpose torch weights when porting parameters."""
    B, input_size = x.shape
    hidden = w1.shape[1]
    num_classes = w2.shape[1]
    out_dtype = x.dtype if out_dtype is None else out_dtype
    compute_dtype = jnp.bfloat16 if use_bf16_matmul else jnp.float32

    # ---- tile-size selection -----------------------------------------------
    # Feature dims lane-aligned (use feature_align=256 on v6e/v7x for large dims).
    Hp = _round_up(hidden, feature_align)
    Np = _round_up(num_classes, feature_align)

    # K reduction axis: balanced 128-granular tiles capped at max_k_block, so W1
    # streams through VMEM instead of being fully resident.
    Kp0 = _round_up(input_size, LANE)
    grid_k = _cdiv(Kp0, max(LANE, max_k_block))
    TK = _cdiv(Kp0 // LANE, grid_k) * LANE
    Kp = TK * grid_k

    # Batch axis: balanced multiple-of-8 tiles; force >= 2 tiles when B > 8 so
    # the "parallel" axis can shard across v7x's 2 TensorCores.
    block_b = max(SUB, _round_up(block_b, SUB))
    n_b = _cdiv(B, block_b)
    if B > SUB:
        n_b = max(n_b, 2)
    TB = _round_up(_cdiv(B, n_b), SUB)
    Bp = _round_up(B, TB)
    grid_b = Bp // TB

    # ---- wrapper-side cast + zero padding (math-preserving) -----------------
    x_p = _pad_to(x.astype(compute_dtype), (Bp, Kp))
    w1_p = _pad_to(w1.astype(compute_dtype), (Kp, Hp))
    w2_p = _pad_to(w2.astype(compute_dtype), (Hp, Np))
    b1_p = _pad_to(b1.astype(jnp.float32).reshape(1, hidden), (1, Hp))
    b2_p = _pad_to(b2.astype(jnp.float32).reshape(1, num_classes), (1, Np))

    # ---- scheduler hint (bytes in sync with bf16 operand DMA) ---------------
    csize = jnp.dtype(compute_dtype).itemsize
    osize = jnp.dtype(out_dtype).itemsize
    flops = 2 * Bp * Kp * Hp + 2 * Bp * Hp * Np
    bytes_accessed = (csize * (x_p.size + w1_p.size + w2_p.size)
                      + 4 * (b1_p.size + b2_p.size)
                      + osize * Bp * Np)
    cost = pl.CostEstimate(flops=flops, transcendentals=0,
                           bytes_accessed=bytes_accessed)

    # ---- explicit scoped-VMEM budget from the actual tile footprint ---------
    acc_bytes = TB * Hp * 4
    x_bytes = 2 * TB * TK * csize                      # double-buffered
    w1_bytes = 2 * TK * Hp * csize                     # double-buffered (k-varying)
    out_bytes = 2 * TB * Np * osize
    const_bytes = 2 * (SUB * Hp * 4 + SUB * Np * 4 + Hp * Np * csize)  # b1,b2,w2
    footprint = acc_bytes + x_bytes + w1_bytes + out_bytes + const_bytes
    vmem_limit = int(min(64 << 20, max(2 * footprint + (4 << 20), 32 << 20)))

    def run(weight_pipeline_mode):
        const_kw = ({} if weight_pipeline_mode is None
                    else dict(pipeline_mode=weight_pipeline_mode))
        in_specs = [
            # x: one (batch, K) tile per grid step.
            pl.BlockSpec((TB, TK), lambda i, k: (i, k)),
            # W1: streamed along K.
            pl.BlockSpec((TK, Hp), lambda i, k: (k, 0)),
            # Block-invariant (DMA'd once, VMEM-resident): b1, W2, b2.
            pl.BlockSpec((1, Hp), lambda i, k: (0, 0), **const_kw),
            pl.BlockSpec((Hp, Np), lambda i, k: (0, 0), **const_kw),
            pl.BlockSpec((1, Np), lambda i, k: (0, 0), **const_kw),
        ]
        out_specs = pl.BlockSpec((TB, Np), lambda i, k: (i, 0))
        call = pl.pallas_call(
            word_classifier_kernel,
            out_shape=jax.ShapeDtypeStruct((Bp, Np), out_dtype),
            grid=(grid_b, grid_k),
            in_specs=in_specs,
            out_specs=out_specs,
            scratch_shapes=[pltpu.VMEM((TB, Hp), jnp.float32)],
            compiler_params=pltpu.CompilerParams(
                dimension_semantics=("parallel", "arbitrary"),
                vmem_limit_bytes=vmem_limit,
            ),
            cost_estimate=cost,
        )
        return call(x_p, w1_p, b1_p, w2_p, b2_p)

    # Single-buffer the block-invariant weight/bias blocks (they are DMA'd once;
    # double-buffering them only doubles resident VMEM).  Fall back to the
    # default pipeline if this Pallas build rejects Buffered(1) here.
    try:
        out_padded = run(pl.Buffered(1))
    except Exception:  # pragma: no cover - depends on jax/Mosaic version
        out_padded = run(None)

    return out_padded[:B, :num_classes]


if __name__ == "__main__":
    # Shapes implied by WordClassifier(input_size, hidden_size, num_classes).
    B, input_size, hidden_size, num_classes = 8, 32, 64, 16

    key = jax.random.PRNGKey(0)
    kx, kw1, kb1, kw2, kb2 = jax.random.split(key, 5)

    x = jax.random.normal(kx, (B, input_size), dtype=jnp.float32)
    # Deterministic synthetic parameters; (in, out) layout for the kernel.
    w1 = jax.random.normal(kw1, (input_size, hidden_size), dtype=jnp.float32) * 0.1
    b1 = jax.random.normal(kb1, (hidden_size,), dtype=jnp.float32) * 0.1
    w2 = jax.random.normal(kw2, (hidden_size, num_classes), dtype=jnp.float32) * 0.1
    b2 = jax.random.normal(kb2, (num_classes,), dtype=jnp.float32) * 0.1

    ref = jnp.maximum(x @ w1 + b1, 0.0) @ w2 + b2

    # f32 MXU path: tight tolerance vs the reference.
    out_f32 = word_classifier_forward(x, w1, b1, w2, b2, use_bf16_matmul=False)
    jax.block_until_ready(out_f32)
    assert out_f32.shape == (B, num_classes)
    assert jnp.allclose(out_f32, ref, atol=1e-5, rtol=1e-5)

    # bf16-operand MXU path (default; full-rate on v5e/v6e/v7x): looser tolerance.
    out_bf16 = word_classifier_forward(x, w1, b1, w2, b2, use_bf16_matmul=True)
    jax.block_until_ready(out_bf16)
    assert out_bf16.shape == (B, num_classes)
    assert jnp.allclose(out_bf16, ref, atol=2e-2, rtol=2e-2)

    # Second config exercising K-reduction tiling (2 K steps), padding, and
    # >= 2 batch tiles on the parallel axis.
    B2, in2, hid2, ncls2 = 24, 320, 96, 10
    k2 = jax.random.split(jax.random.PRNGKey(1), 5)
    x2 = jax.random.normal(k2[0], (B2, in2), dtype=jnp.float32)
    w1b = jax.random.normal(k2[1], (in2, hid2), dtype=jnp.float32) * 0.1
    b1b = jax.random.normal(k2[2], (hid2,), dtype=jnp.float32) * 0.1
    w2b = jax.random.normal(k2[3], (hid2, ncls2), dtype=jnp.float32) * 0.1
    b2b = jax.random.normal(k2[4], (ncls2,), dtype=jnp.float32) * 0.1
    ref2 = jnp.maximum(x2 @ w1b + b1b, 0.0) @ w2b + b2b
    out2 = word_classifier_forward(x2, w1b, b1b, w2b, b2b,
                                   use_bf16_matmul=False, max_k_block=256)
    jax.block_until_ready(out2)
    assert out2.shape == (B2, ncls2)
    assert jnp.allclose(out2, ref2, atol=1e-4, rtol=1e-4)

    print("KERNEL_OK")
</pallas_src>

<mosaic_0001>
module attributes {stable_mosaic.version = 11 : i64} {
  func.func @word_classifier_kernel(%arg0: i32, %arg1: i32, %arg2: memref<8x128xf32, #tpu.memory_space<vmem>>, %arg3: memref<128x128xf32, #tpu.memory_space<vmem>>, %arg4: memref<1x128xf32, #tpu.memory_space<vmem>>, %arg5: memref<128x128xf32, #tpu.memory_space<vmem>>, %arg6: memref<1x128xf32, #tpu.memory_space<vmem>>, %arg7: memref<8x128xf32, #tpu.memory_space<vmem>>, %arg8: memref<8x128xf32, #tpu.memory_space<vmem>>) attributes {dimension_semantics = [#tpu.dimension_semantics<parallel>, #tpu.dimension_semantics<arbitrary>], iteration_bounds = array<i64: 1, 1>, scalar_prefetch = 0 : i64, scratch_operands = 1 : i64, tpu.core_type = #tpu.core_type<tc>, window_params = [{transform_indices = @transform_0, window_bounds = array<i64: 8, 128>}, {transform_indices = @transform_1, window_bounds = array<i64: 128, 128>}, {pipeline_mode = #tpu.pipeline_mode<synchronous>, transform_indices = @transform_2, window_bounds = array<i64: 1, 128>}, {pipeline_mode = #tpu.pipeline_mode<synchronous>, transform_indices = @transform_3, window_bounds = array<i64: 128, 128>}, {pipeline_mode = #tpu.pipeline_mode<synchronous>, transform_indices = @transform_4, window_bounds = array<i64: 1, 128>}, {transform_indices = @transform_5, window_bounds = array<i64: 8, 128>}]} {
    %c0_i32 = arith.constant 0 : i32
    %0 = arith.cmpi eq, %arg1, %c0_i32 : i32
    %1 = arith.extui %0 : i1 to i32
    %c0_i32_0 = arith.constant 0 : i32
    %2 = arith.cmpi ne, %1, %c0_i32_0 : i32
    scf.if %2 {
      %cst_10 = arith.constant 0.000000e+00 : f32
      %12 = vector.broadcast %cst_10 : f32 to vector<8x128xf32>
      %c0_11 = arith.constant 0 : index
      %c0_12 = arith.constant 0 : index
      %13 = vector.load %arg8[%c0_11, %c0_12] : memref<8x128xf32, #tpu.memory_space<vmem>>, vector<8x128xf32>
      tpu.vector_store %arg8[%c0_11, %c0_12], %12 {strides = array<i32>} : memref<8x128xf32, #tpu.memory_space<vmem>>, vector<8x128xf32>,
    } else {
    }
    %c0 = arith.constant 0 : index
    %c0_1 = arith.constant 0 : index
    %3 = vector.load %arg8[%c0, %c0_1] : memref<8x128xf32, #tpu.memory_space<vmem>>, vector<8x128xf32>
    %c0_2 = arith.constant 0 : index
    %c0_3 = arith.constant 0 : index
    %4 = vector.load %arg2[%c0_2, %c0_3] : memref<8x128xf32, #tpu.memory_space<vmem>>, vector<8x128xf32>
    %c0_4 = arith.constant 0 : index
    %c0_5 = arith.constant 0 : index
    %5 = vector.load %arg3[%c0_4, %c0_5] : memref<128x128xf32, #tpu.memory_space<vmem>>, vector<128x128xf32>
    %cst = arith.constant dense<0.000000e+00> : vector<8x128xf32>
    %6 = tpu.matmul %4, %5, %cst {dimension_numbers = #tpu.dot_dimension_numbers<[1], [0], [0], [1], [0, 0, 1, 1], [], []>} : vector<8x128xf32>, vector<128x128xf32>, vector<8x128xf32> -> vector<8x128xf32>
    %7 = arith.addf %3, %6 : vector<8x128xf32>
    %c0_6 = arith.constant 0 : index
    %c0_7 = arith.constant 0 : index
    %8 = vector.load %arg8[%c0_6, %c0_7] : memref<8x128xf32, #tpu.memory_space<vmem>>, vector<8x128xf32>
    tpu.vector_store %arg8[%c0_6, %c0_7], %7 {strides = array<i32>} : memref<8x128xf32, #tpu.memory_space<vmem>>, vector<8x128xf32>,
    %c0_i32_8 = arith.constant 0 : i32
    %9 = arith.cmpi eq, %arg1, %c0_i32_8 : i32
    %10 = arith.extui %9 : i1 to i32
    %c0_i32_9 = arith.constant 0 : i32
    %11 = arith.cmpi ne, %10, %c0_i32_9 : i32
    scf.if %11 {
      %c0_10 = arith.constant 0 : index
      %c0_11 = arith.constant 0 : index
      %12 = vector.load %arg8[%c0_10, %c0_11] : memref<8x128xf32, #tpu.memory_space<vmem>>, vector<8x128xf32>
      %c0_12 = arith.constant 0 : index
      %c0_13 = arith.constant 0 : index
      %13 = vector.load %arg4[%c0_12, %c0_13] : memref<1x128xf32, #tpu.memory_space<vmem>>, vector<1x128xf32>
      %14 = vector.broadcast %13 : vector<1x128xf32> to vector<8x128xf32>
      %15 = arith.addf %12, %14 : vector<8x128xf32>
      %cst_14 = arith.constant 0.000000e+00 : f32
      %16 = vector.broadcast %cst_14 : f32 to vector<8x128xf32>
      %17 = arith.maximumf %15, %16 : vector<8x128xf32>
      %c0_15 = arith.constant 0 : index
      %c0_16 = arith.constant 0 : index
      %18 = vector.load %arg5[%c0_15, %c0_16] : memref<128x128xf32, #tpu.memory_space<vmem>>, vector<128x128xf32>
      %cst_17 = arith.constant dense<0.000000e+00> : vector<8x128xf32>
      %19 = tpu.matmul %17, %18, %cst_17 {dimension_numbers = #tpu.dot_dimension_numbers<[1], [0], [0], [1], [0, 0, 1, 1], [], []>} : vector<8x128xf32>, vector<128x128xf32>, vector<8x128xf32> -> vector<8x128xf32>
      %c0_18 = arith.constant 0 : index
      %c0_19 = arith.constant 0 : index
      %20 = vector.load %arg6[%c0_18, %c0_19] : memref<1x128xf32, #tpu.memory_space<vmem>>, vector<1x128xf32>
      %21 = vector.broadcast %20 : vector<1x128xf32> to vector<8x128xf32>
      %22 = arith.addf %19, %21 : vector<8x128xf32>
      %c0_20 = arith.constant 0 : index
      %c0_21 = arith.constant 0 : index
      %23 = vector.load %arg7[%c0_20, %c0_21] : memref<8x128xf32, #tpu.memory_space<vmem>>, vector<8x128xf32>
      tpu.vector_store %arg7[%c0_20, %c0_21], %22 {strides = array<i32>} : memref<8x128xf32, #tpu.memory_space<vmem>>, vector<8x128xf32>,
    } else {
    }
    return
  }
  func.func @transform_0(%arg0: i32, %arg1: i32) -> (i32, i32) {
    %c0_i32 = arith.constant 0 : i32
    return %arg0, %arg1 : i32, i32
  }
  func.func @transform_1(%arg0: i32, %arg1: i32) -> (i32, i32) {
    %c0_i32 = arith.constant 0 : i32
    %c0_i32_0 = arith.constant 0 : i32
    return %arg1, %c0_i32 : i32, i32
  }
  func.func @transform_2(%arg0: i32, %arg1: i32) -> (i32, i32) {
    %c0_i32 = arith.constant 0 : i32
    %c0_i32_0 = arith.constant 0 : i32
    %c0_i32_1 = arith.constant 0 : i32
    return %c0_i32, %c0_i32_0 : i32, i32
  }
  func.func @transform_3(%arg0: i32, %arg1: i32) -> (i32, i32) {
    %c0_i32 = arith.constant 0 : i32
    %c0_i32_0 = arith.constant 0 : i32
    %c0_i32_1 = arith.constant 0 : i32
    return %c0_i32, %c0_i32_0 : i32, i32
  }
  func.func @transform_4(%arg0: i32, %arg1: i32) -> (i32, i32) {
    %c0_i32 = arith.constant 0 : i32
    %c0_i32_0 = arith.constant 0 : i32
    %c0_i32_1 = arith.constant 0 : i32
    return %c0_i32, %c0_i32_0 : i32, i32
  }
  func.func @transform_5(%arg0: i32, %arg1: i32) -> (i32, i32) {
    %c0_i32 = arith.constant 0 : i32
    %c0_i32_0 = arith.constant 0 : i32
    return %arg0, %c0_i32 : i32, i32
  }
}

module attributes {stable_mosaic.version = 11 : i64} {
  func.func @word_classifier_kernel(%arg0: i32, %arg1: i32, %arg2: memref<8x128xf32, #tpu.memory_space<vmem>>, %arg3: memref<128x128xf32, #tpu.memory_space<vmem>>, %arg4: memref<1x128xf32, #tpu.memory_space<vmem>>, %arg5: memref<128x128xf32, #tpu.memory_space<vmem>>, %arg6: memref<1x128xf32, #tpu.memory_space<vmem>>, %arg7: memref<8x128xf32, #tpu.memory_space<vmem>>, %arg8: memref<8x128xf32, #tpu.memory_space<vmem>>) attributes {dimension_semantics = [#tpu.dimension_semantics<parallel>, #tpu.dimension_semantics<arbitrary>], iteration_bounds = array<i64: 1, 1>, scalar_prefetch = 0 : i64, scratch_operands = 1 : i64, tpu.core_type = #tpu.core_type<tc>, window_params = [{transform_indices = @transform_0, window_bounds = array<i64: 8, 128>}, {transform_indices = @transform_1, window_bounds = array<i64: 128, 128>}, {pipeline_mode = #tpu.pipeline_mode<synchronous>, transform_indices = @transform_2, window_bounds = array<i64: 1, 128>}, {pipeline_mode = #tpu.pipeline_mode<synchronous>, transform_indices = @transform_3, window_bounds = array<i64: 128, 128>}, {pipeline_mode = #tpu.pipeline_mode<synchronous>, transform_indices = @transform_4, window_bounds = array<i64: 1, 128>}, {transform_indices = @transform_5, window_bounds = array<i64: 8, 128>}]} {
    %c0_i32 = arith.constant 0 : i32
    %0 = arith.cmpi eq, %arg1, %c0_i32 : i32
    %1 = arith.extui %0 : i1 to i32
    %c0_i32_0 = arith.constant 0 : i32
    %2 = arith.cmpi ne, %1, %c0_i32_0 : i32
    scf.if %2 {
      %cst_10 = arith.constant 0.000000e+00 : f32
      %12 = vector.broadcast %cst_10 : f32 to vector<8x128xf32>
      %c0_11 = arith.constant 0 : index
      %c0_12 = arith.constant 0 : index
      %13 = vector.load %arg8[%c0_11, %c0_12] : memref<8x128xf32, #tpu.memory_space<vmem>>, vector<8x128xf32>
      tpu.vector_store %arg8[%c0_11, %c0_12], %12 {strides = array<i32>} : memref<8x128xf32, #tpu.memory_space<vmem>>, vector<8x128xf32>,
    } else {
    }
    %c0 = arith.constant 0 : index
    %c0_1 = arith.constant 0 : index
    %3 = vector.load %arg8[%c0, %c0_1] : memref<8x128xf32, #tpu.memory_space<vmem>>, vector<8x128xf32>
    %c0_2 = arith.constant 0 : index
    %c0_3 = arith.constant 0 : index
    %4 = vector.load %arg2[%c0_2, %c0_3] : memref<8x128xf32, #tpu.memory_space<vmem>>, vector<8x128xf32>
    %c0_4 = arith.constant 0 : index
    %c0_5 = arith.constant 0 : index
    %5 = vector.load %arg3[%c0_4, %c0_5] : memref<128x128xf32, #tpu.memory_space<vmem>>, vector<128x128xf32>
    %cst = arith.constant dense<0.000000e+00> : vector<8x128xf32>
    %6 = tpu.matmul %4, %5, %cst {dimension_numbers = #tpu.dot_dimension_numbers<[1], [0], [0], [1], [0, 0, 1, 1], [], []>} : vector<8x128xf32>, vector<128x128xf32>, vector<8x128xf32> -> vector<8x128xf32>
    %7 = arith.addf %3, %6 : vector<8x128xf32>
    %c0_6 = arith.constant 0 : index
    %c0_7 = arith.constant 0 : index
    %8 = vector.load %arg8[%c0_6, %c0_7] : memref<8x128xf32, #tpu.memory_space<vmem>>, vector<8x128xf32>
    tpu.vector_store %arg8[%c0_6, %c0_7], %7 {strides = array<i32>} : memref<8x128xf32, #tpu.memory_space<vmem>>, vector<8x128xf32>,
    %c0_i32_8 = arith.constant 0 : i32
    %9 = arith.cmpi eq, %arg1, %c0_i32_8 : i32
    %10 = arith.extui %9 : i1 to i32
    %c0_i32_9 = arith.constant 0 : i32
    %11 = arith.cmpi ne, %10, %c0_i32_9 : i32
    scf.if %11 {
      %c0_10 = arith.constant 0 : index
      %c0_11 = arith.constant 0 : index
      %12 = vector.load %arg8[%c0_10, %c0_11] : memref<8x128xf32, #tpu.memory_space<vmem>>, vector<8x128xf32>
      %c0_12 = arith.constant 0 : index
      %c0_13 = arith.constant 0 : index
      %13 = vector.load %arg4[%c0_12, %c0_13] : memref<1x128xf32, #tpu.memory_space<vmem>>, vector<1x128xf32>
      %14 = vector.broadcast %13 : vector<1x128xf32> to vector<8x128xf32>
      %15 = arith.addf %12, %14 : vector<8x128xf32>
      %cst_14 = arith.constant 0.000000e+00 : f32
      %16 = vector.broadcast %cst_14 : f32 to vector<8x128xf32>
      %17 = arith.maximumf %15, %16 : vector<8x128xf32>
      %c0_15 = arith.constant 0 : index
      %c0_16 = arith.constant 0 : index
      %18 = vector.load %arg5[%c0_15, %c0_16] : memref<128x128xf32, #tpu.memory_space<vmem>>, vector<128x128xf32>
      %cst_17 = arith.constant dense<0.000000e+00> : vector<8x128xf32>
      %19 = tpu.matmul %17, %18, %cst_17 {dimension_numbers = #tpu.dot_dimension_numbers<[1], [0], [0], [1], [0, 0, 1, 1], [], []>} : vector<8x128xf32>, vector<128x128xf32>, vector<8x128xf32> -> vector<8x128xf32>
      %c0_18 = arith.constant 0 : index
      %c0_19 = arith.constant 0 : index
      %20 = vector.load %arg6[%c0_18, %c0_19] : memref<1x128xf32, #tpu.memory_space<vmem>>, vector<1x128xf32>
      %21 = vector.broadcast %20 : vector<1x128xf32> to vector<8x128xf32>
      %22 = arith.addf %19, %21 : vector<8x128xf32>
      %c0_20 = arith.constant 0 : index
      %c0_21 = arith.constant 0 : index
      %23 = vector.load %arg7[%c0_20, %c0_21] : memref<8x128xf32, #tpu.memory_space<vmem>>, vector<8x128xf32>
      tpu.vector_store %arg7[%c0_20, %c0_21], %22 {strides = array<i32>} : memref<8x128xf32, #tpu.memory_space<vmem>>, vector<8x128xf32>,
    } else {
    }
    return
  }
  func.func @transform_0(%arg0: i32, %arg1: i32) -> (i32, i32) {
    %c0_i32 = arith.constant 0 : i32
    return %arg0, %arg1 : i32, i32
  }
  func.func @transform_1(%arg0: i32, %arg1: i32) -> (i32, i32) {
    %c0_i32 = arith.constant 0 : i32
    %c0_i32_0 = arith.constant 0 : i32
    return %arg1, %c0_i32 : i32, i32
  }
  func.func @transform_2(%arg0: i32, %arg1: i32) -> (i32, i32) {
    %c0_i32 = arith.constant 0 : i32
    %c0_i32_0 = arith.constant 0 : i32
    %c0_i32_1 = arith.constant 0 : i32
    return %c0_i32, %c0_i32_0 : i32, i32
  }
  func.func @transform_3(%arg0: i32, %arg1: i32) -> (i32, i32) {
    %c0_i32 = arith.constant 0 : i32
    %c0_i32_0 = arith.constant 0 : i32
    %c0_i32_1 = arith.constant 0 : i32
    return %c0_i32, %c0_i32_0 : i32, i32
  }
  func.func @transform_4(%arg0: i32, %arg1: i32) -> (i32, i32) {
    %c0_i32 = arith.constant 0 : i32
    %c0_i32_0 = arith.constant 0 : i32
    %c0_i32_1 = arith.constant 0 : i32
    return %c0_i32, %c0_i32_0 : i32, i32
  }
  func.func @transform_5(%arg0: i32, %arg1: i32) -> (i32, i32) {
    %c0_i32 = arith.constant 0 : i32
    %c0_i32_0 = arith.constant 0 : i32
    return %arg0, %c0_i32 : i32, i32
  }
}

</mosaic_0001>

<bundles_post_ra>
// kernel: tpu_custom_call.1
= control target key start
LH: loop header
LB: loop body
LE: loop exit
PB: predicated region body
PF: predicated region fallthrough
CT: control target
= control target key end

     0   :  { %10 = vsyncpa [#allocation4], 0  ;;  %s568_s0 = inlined_call_operand.hbm [shape: f32[8,128], index: 0, kind: input, shape index: {}]   ;;  %s569_s1 = inlined_call_operand.hbm [shape: f32[128,128], index: 1, kind: input, shape index: {}]   ;;  %s570_s2 = inlined_call_operand.vmem [shape: f32[1,128], index: 2, kind: input, shape index: {}]   ;;  %s571_s3 = inlined_call_operand.hbm [shape: f32[128,128], index: 3, kind: input, shape index: {}]   ;;  %s572_s4 = inlined_call_operand.vmem [shape: f32[1,128], index: 4, kind: input, shape index: {}]   ;;  %s573_s5 = inlined_call_operand.hbm [shape: f32[8,128], index: 5, kind: output, shape index: {}]  }
   0x1   :  { %11 = vsyncpa [#allocation7], 0 }
   0x2   :  { %12 = vsyncpa [#allocation5], 0  ;;  %s478_s18 = smov [#allocation6]  }
   0x3   :  { %s28_s19 = sshll.u32 %s478_s18, 4  ;;  %s29_s19 = int_to_ptr.vmem [resolvable:$true] %s28_s19 }
   0x4   :  { %s400_s20 = scalar_lea.vmem %s29_s19, 2048  ;;  %p405_p1 = scmp.lt.s32.totalorder %s29_s19, %s29_s19 }
   0x5   :  { %p401_p0 = scmp.ne.s32.totalorder %s29_s19, %s400_s20  ;;  %p406_p2 = scmp.lt.s32.totalorder %s400_s20, %s400_s20 }
   0x7   :  { %p407_p3 = por %p406_p2, %p405_p1 }
   0x9   :  { %p408_p4 = pnand %p407_p3, %p401_p0 }
   0xb   :  { %411 = shalt.err (!%p408_p4)
}
   0xc   :  { %s479_s21 = smov 128   ;;  %s480_s22 = smov 8  }
   0xd   :  { %34 = dma.hbm_to_vmem [thread:$0]  %s569_s1, 2048, %s29_s19, [#allocation7], %s479_s21, %s479_s21, %s480_s22  }
   0xe   :  { %s481_s25 = smov [#allocation3]   ;;  %s482_s27 = smov [#allocation8]  }
   0xf   :  { %s19_s26 = sshll.u32 %s481_s25, 4  ;;  %s42_s28 = sshll.u32 %s482_s27, 4  ;;  %s20_s26 = int_to_ptr.vmem [resolvable:$true] %s19_s26  ;;  %s43_s28 = int_to_ptr.vmem [resolvable:$true] %s42_s28 }
  0x10   :  { %s420_s29 = scalar_lea.vmem %s20_s26, 128  ;;  %p425_p6 = scmp.lt.s32.totalorder %s20_s26, %s20_s26 }
  0x11   :  { %p421_p5 = scmp.ne.s32.totalorder %s20_s26, %s420_s29  ;;  %p426_p7 = scmp.lt.s32.totalorder %s420_s29, %s420_s29 }
  0x13   :  { %p427_p8 = por %p426_p7, %p425_p6 }
  0x15   :  { %p428_p9 = pnand %p427_p8, %p421_p5 }
  0x17   :  { %431 = shalt.err (!%p428_p9)
}
  0x18   :  { %22 = dma.hbm_to_vmem [thread:$0]  %s568_s0, 128, %s20_s26, [#allocation4]  }
  0x19   :  { %s440_s7 = scalar_lea.vmem %s43_s28, 2048  ;;  %p445_p11 = scmp.lt.s32.totalorder %s43_s28, %s43_s28 }
  0x1a   :  { %p441_p10 = scmp.ne.s32.totalorder %s43_s28, %s440_s7  ;;  %p446_p12 = scmp.lt.s32.totalorder %s440_s7, %s440_s7 }
  0x1c   :  { %p447_p13 = por %p446_p12, %p445_p11 }
  0x1e   :  { %p448_p0 = pnand %p447_p13, %p441_p10 }
  0x20   :  { %451 = shalt.err (!%p448_p0)
}
  0x21   :  { %48 = dma.hbm_to_vmem [thread:$0]  %s571_s3, 2048, %s43_s28, [#allocation7], %s479_s21, %s479_s21, %s480_s22  }
  0x22   :  { %472 = dma.done.wait [#allocation4], 128  }
  0x23   :  { %473 = vsyncadd [#allocation4], 4294967168 }
  0x24   :  { %474 = dma.done.wait [#allocation7], 4096  }
  0x25   :  { %475 = vsyncadd [#allocation7], 4294963200  ;;  %v483_v0 = vmov 0.0   ;;  %vm484_vm0 = vmmov 0   ;;  %v82_v1 = vld [vmem:[#allocation6 + $0x78] sm:$0xff]  ;;  %v81_v2 = vld [vmem:[#allocation6 + $0x70] sm:$0xff] }
  0x26   :  { %314 = vmatprep.subr.mxu0 %v483_v0  ;;  %346 = vmatprep.mubr.msk.f32.mxu0 %vm484_vm0, %v483_v0  ;;  %v80_v3 = vld [vmem:[#allocation6 + $0x68] sm:$0xff]  ;;  %v79_v4 = vld [vmem:[#allocation6 + $0x60] sm:$0xff]  ;;  %v183_v5 = vld [vmem:[#allocation8 + $0x78] sm:$0xff]  ;;  %s485_s11 = smov [#allocation9]  }
  0x27   :  { %349 = vmatprep.subr.mxu1 %v483_v0  ;;  %381 = vmatprep.mubr.msk.f32.mxu1 %vm484_vm0, %v483_v0  ;;  %v78_v6 = vld [vmem:[#allocation6 + $0x58] sm:$0xff]  ;;  %v182_v7 = vld [vmem:[#allocation8 + $0x70] sm:$0xff]  ;;  %v181_v8 = vld [vmem:[#allocation8 + $0x68] sm:$0xff]  ;;  %s268_s12 = sshll.u32 %s485_s11, 4  ;;  %s269_s12 = int_to_ptr.vmem [resolvable:$true] %s268_s12 }
  0x28   :  { %315 = vmatpush3.msra.mxu0 %v82_v1  ;;  %350 = vmatpush3.msra.mxu1 %v183_v5  ;;  %v77_v9 = vld [vmem:[#allocation6 + $0x50] sm:$0xff]  ;;  %v180_v10 = vld [vmem:[#allocation8 + $0x60] sm:$0xff]  ;;  %v76_v11 = vld [vmem:[#allocation6 + $0x48] sm:$0xff]  ;;  %s452_s13 = scalar_lea.vmem %s269_s12, 128  ;;  %p457_p2 = scmp.lt.s32.totalorder %s269_s12, %s269_s12 }
  0x29   :  { %316 = vmatprep.subr.mxu0 %v483_v0  ;;  %351 = vmatprep.subr.mxu1 %v483_v0  ;;  %v179_v12 = vld [vmem:[#allocation8 + $0x58] sm:$0xff]  ;;  %v75_v13 = vld [vmem:[#allocation6 + $0x40] sm:$0xff]  ;;  %v178_v14 = vld [vmem:[#allocation8 + $0x50] sm:$0xff]  ;;  %p453_p1 = scmp.ne.s32.totalorder %s269_s12, %s452_s13  ;;  %p458_p3 = scmp.lt.s32.totalorder %s452_s13, %s452_s13 }
  0x2a   :  { %317 = vmatpush3.msra.mxu0 %v81_v2  ;;  %352 = vmatpush3.msra.mxu1 %v182_v7  ;;  %v74_v15 = vld [vmem:[#allocation6 + $0x38] sm:$0xff]  ;;  %v177_v16 = vld [vmem:[#allocation8 + $0x48] sm:$0xff]  ;;  %v73_v17 = vld [vmem:[#allocation6 + $0x30] sm:$0xff] }
  0x2b   :  { %318 = vmatprep.subr.mxu0 %v483_v0  ;;  %353 = vmatprep.subr.mxu1 %v483_v0  ;;  %v176_v18 = vld [vmem:[#allocation8 + $0x40] sm:$0xff]  ;;  %v72_v19 = vld [vmem:[#allocation6 + $0x28] sm:$0xff]  ;;  %v175_v20 = vld [vmem:[#allocation8 + $0x38] sm:$0xff]  ;;  %p459_p4 = por %p458_p3, %p457_p2 }
  0x2c   :  { %319 = vmatpush3.msra.mxu0 %v80_v3  ;;  %354 = vmatpush3.msra.mxu1 %v181_v8  ;;  %v71_v21 = vld [vmem:[#allocation6 + $0x20] sm:$0xff]  ;;  %v174_v22 = vld [vmem:[#allocation8 + $0x30] sm:$0xff]  ;;  %v70_v23 = vld [vmem:[#allocation6 + $0x18] sm:$0xff] }
  0x2d   :  { %320 = vmatprep.subr.mxu0 %v483_v0  ;;  %355 = vmatprep.subr.mxu1 %v483_v0  ;;  %v173_v24 = vld [vmem:[#allocation8 + $0x28] sm:$0xff]  ;;  %v69_v25 = vld [vmem:[#allocation6 + $0x10] sm:$0xff]  ;;  %v172_v26 = vld [vmem:[#allocation8 + $0x20] sm:$0xff]  ;;  %p460_p5 = pnand %p459_p4, %p453_p1 }
  0x2e   :  { %321 = vmatpush3.msra.mxu0 %v79_v4  ;;  %356 = vmatpush3.msra.mxu1 %v180_v10  ;;  %v68_v27 = vld [vmem:[#allocation6 + $0x8] sm:$0xff]  ;;  %v171_v28 = vld [vmem:[#allocation8 + $0x18] sm:$0xff]  ;;  %v67_v29 = vld [vmem:[#allocation6] sm:$0xff] }
  0x2f   :  { %322 = vmatprep.subr.mxu0 %v483_v0  ;;  %357 = vmatprep.subr.mxu1 %v483_v0  ;;  %v66_v30 = vld [vmem:[#allocation3] sm:$0xff]  ;;  %v170_v31 = vld [vmem:[#allocation8 + $0x10] sm:$0xff]  ;;  %v169_v32 = vld [vmem:[#allocation8 + $0x8] sm:$0xff] }
  0x30   :  { %323 = vmatpush3.msra.mxu0 %v78_v6  ;;  %358 = vmatpush3.msra.mxu1 %v179_v12  ;;  %v168_v33 = vld [vmem:[#allocation8] sm:$0xff]  ;;  %v278_v34 = vld [vmem:[%s570_s2] ss:$0 sm:$0xff] }
  0x31   :  { %324 = vmatprep.subr.mxu0 %v483_v0  ;;  %359 = vmatprep.subr.mxu1 %v483_v0  ;;  %v279_v39 = vld [vmem:[%s572_s4] ss:$0 sm:$0xff] }
  0x32   :  { %325 = vmatpush3.msra.mxu0 %v77_v9  ;;  %360 = vmatpush3.msra.mxu1 %v178_v14 }
  0x33   :  { %326 = vmatprep.subr.mxu0 %v483_v0  ;;  %361 = vmatprep.subr.mxu1 %v483_v0 }
  0x34   :  { %327 = vmatpush3.msra.mxu0 %v76_v11  ;;  %362 = vmatpush3.msra.mxu1 %v177_v16 }
  0x35   :  { %328 = vmatprep.subr.mxu0 %v483_v0  ;;  %363 = vmatprep.subr.mxu1 %v483_v0 }
  0x36   :  { %329 = vmatpush3.msra.mxu0 %v75_v13  ;;  %364 = vmatpush3.msra.mxu1 %v176_v18 }
  0x37   :  { %330 = vmatprep.subr.mxu0 %v483_v0  ;;  %365 = vmatprep.subr.mxu1 %v483_v0 }
  0x38   :  { %331 = vmatpush3.msra.mxu0 %v74_v15  ;;  %366 = vmatpush3.msra.mxu1 %v175_v20 }
  0x39   :  { %332 = vmatprep.subr.mxu0 %v483_v0  ;;  %367 = vmatprep.subr.mxu1 %v483_v0 }
  0x3a   :  { %333 = vmatpush3.msra.mxu0 %v73_v17  ;;  %368 = vmatpush3.msra.mxu1 %v174_v22 }
  0x3b   :  { %334 = vmatprep.subr.mxu0 %v483_v0  ;;  %369 = vmatprep.subr.mxu1 %v483_v0 }
  0x3c   :  { %335 = vmatpush3.msra.mxu0 %v72_v19  ;;  %370 = vmatpush3.msra.mxu1 %v173_v24 }
  0x3d   :  { %336 = vmatprep.subr.mxu0 %v483_v0  ;;  %371 = vmatprep.subr.mxu1 %v483_v0 }
  0x3e   :  { %337 = vmatpush3.msra.mxu0 %v71_v21  ;;  %372 = vmatpush3.msra.mxu1 %v172_v26 }
  0x3f   :  { %338 = vmatprep.subr.mxu0 %v483_v0  ;;  %373 = vmatprep.subr.mxu1 %v483_v0 }
  0x40   :  { %339 = vmatpush3.msra.mxu0 %v70_v23  ;;  %374 = vmatpush3.msra.mxu1 %v171_v28 }
  0x41   :  { %340 = vmatprep.subr.mxu0 %v483_v0  ;;  %375 = vmatprep.subr.mxu1 %v483_v0 }
  0x42   :  { %341 = vmatpush3.msra.mxu0 %v69_v25  ;;  %376 = vmatpush3.msra.mxu1 %v170_v31 }
  0x43   :  { %342 = vmatprep.subr.mxu0 %v483_v0  ;;  %377 = vmatprep.subr.mxu1 %v483_v0 }
  0x44   :  { %343 = vmatpush3.msra.mxu0 %v68_v27  ;;  %378 = vmatpush3.msra.mxu1 %v169_v32 }
  0x45   :  { %344 = vmatprep.subr.mxu0 %v483_v0  ;;  %379 = vmatprep.subr.mxu1 %v483_v0 }
  0x46   :  { %345 = vmatpush3.msra.mxu0 %v67_v29  ;;  %380 = vmatpush3.msra.mxu1 %v168_v33 }
  0x47   :  { %347 = vmatmul.mubr.f32.vlgmr.msra.gmra.mxu0 %v66_v30 }
 0x107   :  { %v149_v35 = vpop.f32.mrf.mxu0 }
 0x108   :  { %v166_v36 = vadd.f32 %v278_v34, %v149_v35 }
 0x109   :  { %v348_v37 = vpop.f32.mrf.mxu0 }
 0x10a   :  { %v167_v38 = vmax.f32 %v166_v36, 0.0 }
 0x10c   :  { %382 = vmatmul.mubr.f32.vlgmr.msra.gmra.mxu1 %v167_v38 }
 0x1cc   :  { %v257_v40 = vpop.f32.mrf.mxu1 }
 0x1cd   :  { %v258_v41 = vadd.f32 %v279_v39, %v257_v40 }
 0x1ce   :  { %v383_v42 = vpop.f32.mrf.mxu1 }
 0x1cf   :  { %261 = vst [vmem:[#allocation9] sm:$0xff] %v258_v41 }
 0x1d0   :  { %463 = shalt.err (!%p460_p5)
}
 0x1d1   :  { %271 = dma.vmem_to_hbm [thread:$0]  %s269_s12, 128, %s573_s5, [#allocation5]  }
 0x1d2   :  { %476 = dma.done.wait [#allocation5], 128  }
 0x1d3   :  { %477 = vsyncadd [#allocation5], 4294967168 }
 0x1d4   :  { %275 = vsyncpa [#allocation4], 1 }
 0x1d5   :  { %276 = vsyncpa [#allocation7], 1 }
 0x1d6   :  { %277 = vsyncpa [#allocation5], 1 }

// kernel: tpu_custom_call.1
= control target key start
LH: loop header
LB: loop body
LE: loop exit
PB: predicated region body
PF: predicated region fallthrough
CT: control target
= control target key end

     0   :  { %10 = vsyncpa [#allocation4], 0  ;;  %s568_s0 = inlined_call_operand.hbm [shape: f32[8,128], index: 0, kind: input, shape index: {}]   ;;  %s569_s1 = inlined_call_operand.hbm [shape: f32[128,128], index: 1, kind: input, shape index: {}]   ;;  %s570_s2 = inlined_call_operand.vmem [shape: f32[1,128], index: 2, kind: input, shape index: {}]   ;;  %s571_s3 = inlined_call_operand.hbm [shape: f32[128,128], index: 3, kind: input, shape index: {}]   ;;  %s572_s4 = inlined_call_operand.vmem [shape: f32[1,128], index: 4, kind: input, shape index: {}]   ;;  %s573_s5 = inlined_call_operand.hbm [shape: f32[8,128], index: 5, kind: output, shape index: {}]  }
   0x1   :  { %11 = vsyncpa [#allocation7], 0 }
   0x2   :  { %12 = vsyncpa [#allocation5], 0  ;;  %s478_s18 = smov [#allocation6]  }
   0x3   :  { %s28_s19 = sshll.u32 %s478_s18, 4  ;;  %s29_s19 = int_to_ptr.vmem [resolvable:$true] %s28_s19 }
   0x4   :  { %s400_s20 = scalar_lea.vmem %s29_s19, 2048  ;;  %p405_p1 = scmp.lt.s32.totalorder %s29_s19, %s29_s19 }
   0x5   :  { %p401_p0 = scmp.ne.s32.totalorder %s29_s19, %s400_s20  ;;  %p406_p2 = scmp.lt.s32.totalorder %s400_s20, %s400_s20 }
   0x7   :  { %p407_p3 = por %p406_p2, %p405_p1 }
   0x9   :  { %p408_p4 = pnand %p407_p3, %p401_p0 }
   0xb   :  { %411 = shalt.err (!%p408_p4)
}
   0xc   :  { %s479_s21 = smov 128   ;;  %s480_s22 = smov 8  }
   0xd   :  { %34 = dma.hbm_to_vmem [thread:$0]  %s569_s1, 2048, %s29_s19, [#allocation7], %s479_s21, %s479_s21, %s480_s22  }
   0xe   :  { %s481_s25 = smov [#allocation3]   ;;  %s482_s27 = smov [#allocation8]  }
   0xf   :  { %s19_s26 = sshll.u32 %s481_s25, 4  ;;  %s42_s28 = sshll.u32 %s482_s27, 4  ;;  %s20_s26 = int_to_ptr.vmem [resolvable:$true] %s19_s26  ;;  %s43_s28 = int_to_ptr.vmem [resolvable:$true] %s42_s28 }
  0x10   :  { %s420_s29 = scalar_lea.vmem %s20_s26, 128  ;;  %p425_p6 = scmp.lt.s32.totalorder %s20_s26, %s20_s26 }
  0x11   :  { %p421_p5 = scmp.ne.s32.totalorder %s20_s26, %s420_s29  ;;  %p426_p7 = scmp.lt.s32.totalorder %s420_s29, %s420_s29 }
  0x13   :  { %p427_p8 = por %p426_p7, %p425_p6 }
  0x15   :  { %p428_p9 = pnand %p427_p8, %p421_p5 }
  0x17   :  { %431 = shalt.err (!%p428_p9)
}
  0x18   :  { %22 = dma.hbm_to_vmem [thread:$0]  %s568_s0, 128, %s20_s26, [#allocation4]  }
  0x19   :  { %s440_s7 = scalar_lea.vmem %s43_s28, 2048  ;;  %p445_p11 = scmp.lt.s32.totalorder %s43_s28, %s43_s28 }
  0x1a   :  { %p441_p10 = scmp.ne.s32.totalorder %s43_s28, %s440_s7  ;;  %p446_p12 = scmp.lt.s32.totalorder %s440_s7, %s440_s7 }
  0x1c   :  { %p447_p13 = por %p446_p12, %p445_p11 }
  0x1e   :  { %p448_p0 = pnand %p447_p13, %p441_p10 }
  0x20   :  { %451 = shalt.err (!%p448_p0)
}
  0x21   :  { %48 = dma.hbm_to_vmem [thread:$0]  %s571_s3, 2048, %s43_s28, [#allocation7], %s479_s21, %s479_s21, %s480_s22  }
  0x22   :  { %472 = dma.done.wait [#allocation4], 128  }
  0x23   :  { %473 = vsyncadd [#allocation4], 4294967168 }
  0x24   :  { %474 = dma.done.wait [#allocation7], 4096  }
  0x25   :  { %475 = vsyncadd [#allocation7], 4294963200  ;;  %v483_v0 = vmov 0.0   ;;  %vm484_vm0 = vmmov 0   ;;  %v82_v1 = vld [vmem:[#allocation6 + $0x78] sm:$0xff]  ;;  %v81_v2 = vld [vmem:[#allocation6 + $0x70] sm:$0xff] }
  0x26   :  { %314 = vmatprep.subr.mxu0 %v483_v0  ;;  %346 = vmatprep.mubr.msk.f32.mxu0 %vm484_vm0, %v483_v0  ;;  %v80_v3 = vld [vmem:[#allocation6 + $0x68] sm:$0xff]  ;;  %v79_v4 = vld [vmem:[#allocation6 + $0x60] sm:$0xff]  ;;  %v183_v5 = vld [vmem:[#allocation8 + $0x78] sm:$0xff]  ;;  %s485_s11 = smov [#allocation9]  }
  0x27   :  { %349 = vmatprep.subr.mxu1 %v483_v0  ;;  %381 = vmatprep.mubr.msk.f32.mxu1 %vm484_vm0, %v483_v0  ;;  %v78_v6 = vld [vmem:[#allocation6 + $0x58] sm:$0xff]  ;;  %v182_v7 = vld [vmem:[#allocation8 + $0x70] sm:$0xff]  ;;  %v181_v8 = vld [vmem:[#allocation8 + $0x68] sm:$0xff]  ;;  %s268_s12 = sshll.u32 %s485_s11, 4  ;;  %s269_s12 = int_to_ptr.vmem [resolvable:$true] %s268_s12 }
  0x28   :  { %315 = vmatpush3.msra.mxu0 %v82_v1  ;;  %350 = vmatpush3.msra.mxu1 %v183_v5  ;;  %v77_v9 = vld [vmem:[#allocation6 + $0x50] sm:$0xff]  ;;  %v180_v10 = vld [vmem:[#allocation8 + $0x60] sm:$0xff]  ;;  %v76_v11 = vld [vmem:[#allocation6 + $0x48] sm:$0xff]  ;;  %s452_s13 = scalar_lea.vmem %s269_s12, 128  ;;  %p457_p2 = scmp.lt.s32.totalorder %s269_s12, %s269_s12 }
  0x29   :  { %316 = vmatprep.subr.mxu0 %v483_v0  ;;  %351 = vmatprep.subr.mxu1 %v483_v0  ;;  %v179_v12 = vld [vmem:[#allocation8 + $0x58] sm:$0xff]  ;;  %v75_v13 = vld [vmem:[#allocation6 + $0x40] sm:$0xff]  ;;  %v178_v14 = vld [vmem:[#allocation8 + $0x50] sm:$0xff]  ;;  %p453_p1 = scmp.ne.s32.totalorder %s269_s12, %s452_s13  ;;  %p458_p3 = scmp.lt.s32.totalorder %s452_s13, %s452_s13 }
  0x2a   :  { %317 = vmatpush3.msra.mxu0 %v81_v2  ;;  %352 = vmatpush3.msra.mxu1 %v182_v7  ;;  %v74_v15 = vld [vmem:[#allocation6 + $0x38] sm:$0xff]  ;;  %v177_v16 = vld [vmem:[#allocation8 + $0x48] sm:$0xff]  ;;  %v73_v17 = vld [vmem:[#allocation6 + $0x30] sm:$0xff] }
  0x2b   :  { %318 = vmatprep.subr.mxu0 %v483_v0  ;;  %353 = vmatprep.subr.mxu1 %v483_v0  ;;  %v176_v18 = vld [vmem:[#allocation8 + $0x40] sm:$0xff]  ;;  %v72_v19 = vld [vmem:[#allocation6 + $0x28] sm:$0xff]  ;;  %v175_v20 = vld [vmem:[#allocation8 + $0x38] sm:$0xff]  ;;  %p459_p4 = por %p458_p3, %p457_p2 }
  0x2c   :  { %319 = vmatpush3.msra.mxu0 %v80_v3  ;;  %354 = vmatpush3.msra.mxu1 %v181_v8  ;;  %v71_v21 = vld [vmem:[#allocation6 + $0x20] sm:$0xff]  ;;  %v174_v22 = vld [vmem:[#allocation8 + $0x30] sm:$0xff]  ;;  %v70_v23 = vld [vmem:[#allocation6 + $0x18] sm:$0xff] }
  0x2d   :  { %320 = vmatprep.subr.mxu0 %v483_v0  ;;  %355 = vmatprep.subr.mxu1 %v483_v0  ;;  %v173_v24 = vld [vmem:[#allocation8 + $0x28] sm:$0xff]  ;;  %v69_v25 = vld [vmem:[#allocation6 + $0x10] sm:$0xff]  ;;  %v172_v26 = vld [vmem:[#allocation8 + $0x20] sm:$0xff]  ;;  %p460_p5 = pnand %p459_p4, %p453_p1 }
  0x2e   :  { %321 = vmatpush3.msra.mxu0 %v79_v4  ;;  %356 = vmatpush3.msra.mxu1 %v180_v10  ;;  %v68_v27 = vld [vmem:[#allocation6 + $0x8] sm:$0xff]  ;;  %v171_v28 = vld [vmem:[#allocation8 + $0x18] sm:$0xff]  ;;  %v67_v29 = vld [vmem:[#allocation6] sm:$0xff] }
  0x2f   :  { %322 = vmatprep.subr.mxu0 %v483_v0  ;;  %357 = vmatprep.subr.mxu1 %v483_v0  ;;  %v66_v30 = vld [vmem:[#allocation3] sm:$0xff]  ;;  %v170_v31 = vld [vmem:[#allocation8 + $0x10] sm:$0xff]  ;;  %v169_v32 = vld [vmem:[#allocation8 + $0x8] sm:$0xff] }
  0x30   :  { %323 = vmatpush3.msra.mxu0 %v78_v6  ;;  %358 = vmatpush3.msra.mxu1 %v179_v12  ;;  %v168_v33 = vld [vmem:[#allocation8] sm:$0xff]  ;;  %v278_v34 = vld [vmem:[%s570_s2] ss:$0 sm:$0xff] }
  0x31   :  { %324 = vmatprep.subr.mxu0 %v483_v0  ;;  %359 = vmatprep.subr.mxu1 %v483_v0  ;;  %v279_v39 = vld [vmem:[%s572_s4] ss:$0 sm:$0xff] }
  0x32   :  { %325 = vmatpush3.msra.mxu0 %v77_v9  ;;  %360 = vmatpush3.msra.mxu1 %v178_v14 }
  0x33   :  { %326 = vmatprep.subr.mxu0 %v483_v0  ;;  %361 = vmatprep.subr.mxu1 %v483_v0 }
  0x34   :  { %327 = vmatpush3.msra.mxu0 %v76_v11  ;;  %362 = vmatpush3.msra.mxu1 %v177_v16 }
  0x35   :  { %328 = vmatprep.subr.mxu0 %v483_v0  ;;  %363 = vmatprep.subr.mxu1 %v483_v0 }
  0x36   :  { %329 = vmatpush3.msra.mxu0 %v75_v13  ;;  %364 = vmatpush3.msra.mxu1 %v176_v18 }
  0x37   :  { %330 = vmatprep.subr.mxu0 %v483_v0  ;;  %365 = vmatprep.subr.mxu1 %v483_v0 }
  0x38   :  { %331 = vmatpush3.msra.mxu0 %v74_v15  ;;  %366 = vmatpush3.msra.mxu1 %v175_v20 }
  0x39   :  { %332 = vmatprep.subr.mxu0 %v483_v0  ;;  %367 = vmatprep.subr.mxu1 %v483_v0 }
  0x3a   :  { %333 = vmatpush3.msra.mxu0 %v73_v17  ;;  %368 = vmatpush3.msra.mxu1 %v174_v22 }
  0x3b   :  { %334 = vmatprep.subr.mxu0 %v483_v0  ;;  %369 = vmatprep.subr.mxu1 %v483_v0 }
  0x3c   :  { %335 = vmatpush3.msra.mxu0 %v72_v19  ;;  %370 = vmatpush3.msra.mxu1 %v173_v24 }
  0x3d   :  { %336 = vmatprep.subr.mxu0 %v483_v0  ;;  %371 = vmatprep.subr.mxu1 %v483_v0 }
  0x3e   :  { %337 = vmatpush3.msra.mxu0 %v71_v21  ;;  %372 = vmatpush3.msra.mxu1 %v172_v26 }
  0x3f   :  { %338 = vmatprep.subr.mxu0 %v483_v0  ;;  %373 = vmatprep.subr.mxu1 %v483_v0 }
  0x40   :  { %339 = vmatpush3.msra.mxu0 %v70_v23  ;;  %374 = vmatpush3.msra.mxu1 %v171_v28 }
  0x41   :  { %340 = vmatprep.subr.mxu0 %v483_v0  ;;  %375 = vmatprep.subr.mxu1 %v483_v0 }
  0x42   :  { %341 = vmatpush3.msra.mxu0 %v69_v25  ;;  %376 = vmatpush3.msra.mxu1 %v170_v31 }
  0x43   :  { %342 = vmatprep.subr.mxu0 %v483_v0  ;;  %377 = vmatprep.subr.mxu1 %v483_v0 }
  0x44   :  { %343 = vmatpush3.msra.mxu0 %v68_v27  ;;  %378 = vmatpush3.msra.mxu1 %v169_v32 }
  0x45   :  { %344 = vmatprep.subr.mxu0 %v483_v0  ;;  %379 = vmatprep.subr.mxu1 %v483_v0 }
  0x46   :  { %345 = vmatpush3.msra.mxu0 %v67_v29  ;;  %380 = vmatpush3.msra.mxu1 %v168_v33 }
  0x47   :  { %347 = vmatmul.mubr.f32.vlgmr.msra.gmra.mxu0 %v66_v30 }
 0x107   :  { %v149_v35 = vpop.f32.mrf.mxu0 }
 0x108   :  { %v166_v36 = vadd.f32 %v278_v34, %v149_v35 }
 0x109   :  { %v348_v37 = vpop.f32.mrf.mxu0 }
 0x10a   :  { %v167_v38 = vmax.f32 %v166_v36, 0.0 }
 0x10c   :  { %382 = vmatmul.mubr.f32.vlgmr.msra.gmra.mxu1 %v167_v38 }
 0x1cc   :  { %v257_v40 = vpop.f32.mrf.mxu1 }
 0x1cd   :  { %v258_v41 = vadd.f32 %v279_v39, %v257_v40 }
 0x1ce   :  { %v383_v42 = vpop.f32.mrf.mxu1 }
 0x1cf   :  { %261 = vst [vmem:[#allocation9] sm:$0xff] %v258_v41 }
 0x1d0   :  { %463 = shalt.err (!%p460_p5)
}
 0x1d1   :  { %271 = dma.vmem_to_hbm [thread:$0]  %s269_s12, 128, %s573_s5, [#allocation5]  }
 0x1d2   :  { %476 = dma.done.wait [#allocation5], 128  }
 0x1d3   :  { %477 = vsyncadd [#allocation5], 4294967168 }
 0x1d4   :  { %275 = vsyncpa [#allocation4], 1 }
 0x1d5   :  { %276 = vsyncpa [#allocation7], 1 }
 0x1d6   :  { %277 = vsyncpa [#allocation5], 1 }

</bundles_post_ra>
